<compile_context>
chip_gen: v7x
topology: tpu7x:2x2x1
jax: 0.10.0
libtpu: 0.0.40
codegen_flags: <defaults>
</compile_context>

<pallas_src>
import jax
import jax.numpy as jnp
from jax.experimental import pallas as pl
from jax.experimental.pallas import tpu as pltpu

_LANE = 128
_SUBLANE = 8


def _round_up(n, m):
    return ((n + m - 1) // m) * m


def ann_kernel(x_ref, w1_ref, b1_ref, w2_ref, b2_ref, w3_ref, b3_ref, o_ref):
    x = x_ref[...]

    # input_to_hl (Linear, no activation)
    h = jnp.dot(x, w1_ref[...], preferred_element_type=jnp.float32) + b1_ref[...]

    # hl_to_hl (Linear) then ReLU (VPU)
    h = jnp.dot(h, w2_ref[...], preferred_element_type=jnp.float32) + b2_ref[...]
    h = jnp.maximum(h, 0.0)

    # hl_to_output (Linear) then Sigmoid (lax.logistic -> EUP)
    y = jnp.dot(h, w3_ref[...], preferred_element_type=jnp.float32) + b3_ref[...]
    o_ref[...] = jax.nn.sigmoid(y)


def prepare_params(params):
    """One-time, outside the hot path: transpose torch-layout (out, in) weights to
    (in, out) and zero-pad the hidden / output feature dims up to 128 lanes.
    Zero padding is exact for the linear layers; padded output columns produce
    sigmoid(0)=0.5 and are sliced away in ann_forward."""
    w1, b1 = params["w1"], params["b1"]   # (hl, len_in), (hl,)
    w2, b2 = params["w2"], params["b2"]   # (hl, hl),     (hl,)
    w3, b3 = params["w3"], params["b3"]   # (len_out, hl),(len_out,)
    hl, len_in = w1.shape
    len_out = w3.shape[0]

    hl_p = _round_up(hl, _LANE)
    out_p = _round_up(len_out, _LANE)

    w1p = jnp.zeros((len_in, hl_p), jnp.float32).at[:, :hl].set(w1.T)
    b1p = jnp.zeros((1, hl_p), jnp.float32).at[0, :hl].set(b1)
    w2p = jnp.zeros((hl_p, hl_p), jnp.float32).at[:hl, :hl].set(w2.T)
    b2p = jnp.zeros((1, hl_p), jnp.float32).at[0, :hl].set(b2)
    w3p = jnp.zeros((hl_p, out_p), jnp.float32).at[:hl, :len_out].set(w3.T)
    b3p = jnp.zeros((1, out_p), jnp.float32).at[0, :len_out].set(b3)

    return {"w1": w1p, "b1": b1p, "w2": w2p, "b2": b2p, "w3": w3p, "b3": b3p,
            "len_out": len_out}


def ann_forward(x, prep):
    """x: (B, len_in) f32. prep: output of prepare_params."""
    B, len_in = x.shape
    len_out = prep["len_out"]
    w1, b1 = prep["w1"], prep["b1"]
    w2, b2 = prep["w2"], prep["b2"]
    w3, b3 = prep["w3"], prep["b3"]
    out_p = w3.shape[1]

    # Batch tile: one grid step for small/medium batches, 512-row tiles otherwise
    # (big tiles amortize ~0.35 us per-step overhead; per-step VMEM stays tiny:
    # x tile + out tile double-buffered + resident padded weights << 32 MiB).
    if B <= 1024:
        TB = _round_up(B, _SUBLANE)
    else:
        TB = 512
    B_pad = _round_up(B, TB)
    if B_pad != B:
        x = jnp.pad(x, ((0, B_pad - B), (0, 0)))

    grid = (B_pad // TB,)
    resident = lambda shape: pl.BlockSpec(shape, lambda i: (0, 0))

    y_pad = pl.pallas_call(
        ann_kernel,
        out_shape=jax.ShapeDtypeStruct((B_pad, out_p), jnp.float32),
        grid=grid,
        in_specs=[
            pl.BlockSpec((TB, len_in), lambda i: (i, 0)),   # streamed per tile
            resident(w1.shape), resident(b1.shape),         # VMEM-resident
            resident(w2.shape), resident(b2.shape),
            resident(w3.shape), resident(b3.shape),
        ],
        out_specs=pl.BlockSpec((TB, out_p), lambda i: (i, 0)),  # lane-dense store
        compiler_params=pltpu.CompilerParams(
            dimension_semantics=("parallel",),
        ),
    )(x, w1, b1, w2, b2, w3, b3)

    # Slice away batch padding and padded output columns (which are sigmoid(0)=0.5).
    return y_pad[:B, :len_out]


def init_params(key, len_in, len_out):
    """Deterministic init mirroring nn.Linear's U(-1/sqrt(fan_in), 1/sqrt(fan_in))."""
    hl = max(len_in, len_out) + 1
    keys = jax.random.split(key, 6)

    def lin(kw, kb, fan_in, fan_out):
        bound = 1.0 / jnp.sqrt(fan_in)
        w = jax.random.uniform(kw, (fan_out, fan_in), jnp.float32, -bound, bound)
        b = jax.random.uniform(kb, (fan_out,), jnp.float32, -bound, bound)
        return w, b

    w1, b1 = lin(keys[0], keys[1], len_in, hl)
    w2, b2 = lin(keys[2], keys[3], hl, hl)
    w3, b3 = lin(keys[4], keys[5], hl, len_out)
    return {"w1": w1, "b1": b1, "w2": w2, "b2": b2, "w3": w3, "b3": b3}


def ann_reference(x, p):
    h = x @ p["w1"].T + p["b1"]
    h = h @ p["w2"].T + p["b2"]
    h = jnp.maximum(h, 0.0)
    y = h @ p["w3"].T + p["b3"]
    return jax.nn.sigmoid(y)


if __name__ == "__main__":
    key = jax.random.PRNGKey(0)
    k_x, k_p = jax.random.split(key)

    batch, len_in, len_out = 8, 16, 8          # hl = max(16, 8) + 1 = 17
    x = jax.random.normal(k_x, (batch, len_in), jnp.float32)
    params = init_params(k_p, len_in, len_out)

    prep = prepare_params(params)              # one-time pad + transpose
    y = ann_forward(x, prep)
    y = jax.block_until_ready(y)

    y_ref = ann_reference(x, params)
    assert y.shape == (batch, len_out)
    assert jnp.allclose(y, y_ref, atol=1e-5, rtol=1e-5), "mismatch vs reference"

    print("KERNEL_OK")
</pallas_src>

<mosaic_0001>
module attributes {stable_mosaic.version = 11 : i64} {
  func.func @ann_kernel(%arg0: i32, %arg1: memref<8x16xf32, #tpu.memory_space<vmem>>, %arg2: memref<16x128xf32, #tpu.memory_space<vmem>>, %arg3: memref<1x128xf32, #tpu.memory_space<vmem>>, %arg4: memref<128x128xf32, #tpu.memory_space<vmem>>, %arg5: memref<1x128xf32, #tpu.memory_space<vmem>>, %arg6: memref<128x128xf32, #tpu.memory_space<vmem>>, %arg7: memref<1x128xf32, #tpu.memory_space<vmem>>, %arg8: memref<8x128xf32, #tpu.memory_space<vmem>>) attributes {dimension_semantics = [#tpu.dimension_semantics<parallel>], iteration_bounds = array<i64: 1>, scalar_prefetch = 0 : i64, scratch_operands = 0 : i64, tpu.core_type = #tpu.core_type<tc>, window_params = [{transform_indices = @transform_0, window_bounds = array<i64: 8, 16>}, {pipeline_mode = #tpu.pipeline_mode<synchronous>, transform_indices = @transform_1, window_bounds = array<i64: 16, 128>}, {pipeline_mode = #tpu.pipeline_mode<synchronous>, transform_indices = @transform_2, window_bounds = array<i64: 1, 128>}, {pipeline_mode = #tpu.pipeline_mode<synchronous>, transform_indices = @transform_3, window_bounds = array<i64: 128, 128>}, {pipeline_mode = #tpu.pipeline_mode<synchronous>, transform_indices = @transform_4, window_bounds = array<i64: 1, 128>}, {pipeline_mode = #tpu.pipeline_mode<synchronous>, transform_indices = @transform_5, window_bounds = array<i64: 128, 128>}, {pipeline_mode = #tpu.pipeline_mode<synchronous>, transform_indices = @transform_6, window_bounds = array<i64: 1, 128>}, {transform_indices = @transform_7, window_bounds = array<i64: 8, 128>}]} {
    %c0 = arith.constant 0 : index
    %c0_0 = arith.constant 0 : index
    %0 = vector.load %arg1[%c0, %c0_0] : memref<8x16xf32, #tpu.memory_space<vmem>>, vector<8x16xf32>
    %c0_1 = arith.constant 0 : index
    %c0_2 = arith.constant 0 : index
    %1 = vector.load %arg2[%c0_1, %c0_2] : memref<16x128xf32, #tpu.memory_space<vmem>>, vector<16x128xf32>
    %cst = arith.constant dense<0.000000e+00> : vector<8x128xf32>
    %2 = tpu.matmul %0, %1, %cst {dimension_numbers = #tpu.dot_dimension_numbers<[1], [0], [0], [1], [0, 0, 1, 1], [], []>} : vector<8x16xf32>, vector<16x128xf32>, vector<8x128xf32> -> vector<8x128xf32>
    %c0_3 = arith.constant 0 : index
    %c0_4 = arith.constant 0 : index
    %3 = vector.load %arg3[%c0_3, %c0_4] : memref<1x128xf32, #tpu.memory_space<vmem>>, vector<1x128xf32>
    %4 = vector.broadcast %3 : vector<1x128xf32> to vector<8x128xf32>
    %5 = arith.addf %2, %4 : vector<8x128xf32>
    %c0_5 = arith.constant 0 : index
    %c0_6 = arith.constant 0 : index
    %6 = vector.load %arg4[%c0_5, %c0_6] : memref<128x128xf32, #tpu.memory_space<vmem>>, vector<128x128xf32>
    %cst_7 = arith.constant dense<0.000000e+00> : vector<8x128xf32>
    %7 = tpu.matmul %5, %6, %cst_7 {dimension_numbers = #tpu.dot_dimension_numbers<[1], [0], [0], [1], [0, 0, 1, 1], [], []>} : vector<8x128xf32>, vector<128x128xf32>, vector<8x128xf32> -> vector<8x128xf32>
    %c0_8 = arith.constant 0 : index
    %c0_9 = arith.constant 0 : index
    %8 = vector.load %arg5[%c0_8, %c0_9] : memref<1x128xf32, #tpu.memory_space<vmem>>, vector<1x128xf32>
    %9 = vector.broadcast %8 : vector<1x128xf32> to vector<8x128xf32>
    %10 = arith.addf %7, %9 : vector<8x128xf32>
    %cst_10 = arith.constant 0.000000e+00 : f32
    %11 = vector.broadcast %cst_10 : f32 to vector<8x128xf32>
    %12 = arith.maximumf %10, %11 : vector<8x128xf32>
    %c0_11 = arith.constant 0 : index
    %c0_12 = arith.constant 0 : index
    %13 = vector.load %arg6[%c0_11, %c0_12] : memref<128x128xf32, #tpu.memory_space<vmem>>, vector<128x128xf32>
    %cst_13 = arith.constant dense<0.000000e+00> : vector<8x128xf32>
    %14 = tpu.matmul %12, %13, %cst_13 {dimension_numbers = #tpu.dot_dimension_numbers<[1], [0], [0], [1], [0, 0, 1, 1], [], []>} : vector<8x128xf32>, vector<128x128xf32>, vector<8x128xf32> -> vector<8x128xf32>
    %c0_14 = arith.constant 0 : index
    %c0_15 = arith.constant 0 : index
    %15 = vector.load %arg7[%c0_14, %c0_15] : memref<1x128xf32, #tpu.memory_space<vmem>>, vector<1x128xf32>
    %16 = vector.broadcast %15 : vector<1x128xf32> to vector<8x128xf32>
    %17 = arith.addf %14, %16 : vector<8x128xf32>
    %18 = arith.negf %17 : vector<8x128xf32>
    %19 = math.exp %18 : vector<8x128xf32>
    %cst_16 = arith.constant 1.000000e+00 : f32
    %20 = vector.broadcast %cst_16 : f32 to vector<8x128xf32>
    %21 = arith.addf %20, %19 : vector<8x128xf32>
    %22 = arith.divf %20, %21 : vector<8x128xf32>
    %c0_17 = arith.constant 0 : index
    %c0_18 = arith.constant 0 : index
    %23 = vector.load %arg8[%c0_17, %c0_18] : memref<8x128xf32, #tpu.memory_space<vmem>>, vector<8x128xf32>
    tpu.vector_store %arg8[%c0_17, %c0_18], %22 {strides = array<i32>} : memref<8x128xf32, #tpu.memory_space<vmem>>, vector<8x128xf32>,
    return
  }
  func.func @transform_0(%arg0: i32) -> (i32, i32) {
    %c0_i32 = arith.constant 0 : i32
    %c0_i32_0 = arith.constant 0 : i32
    return %arg0, %c0_i32 : i32, i32
  }
  func.func @transform_1(%arg0: i32) -> (i32, i32) {
    %c0_i32 = arith.constant 0 : i32
    %c0_i32_0 = arith.constant 0 : i32
    %c0_i32_1 = arith.constant 0 : i32
    return %c0_i32, %c0_i32_0 : i32, i32
  }
  func.func @transform_2(%arg0: i32) -> (i32, i32) {
    %c0_i32 = arith.constant 0 : i32
    %c0_i32_0 = arith.constant 0 : i32
    %c0_i32_1 = arith.constant 0 : i32
    return %c0_i32, %c0_i32_0 : i32, i32
  }
  func.func @transform_3(%arg0: i32) -> (i32, i32) {
    %c0_i32 = arith.constant 0 : i32
    %c0_i32_0 = arith.constant 0 : i32
    %c0_i32_1 = arith.constant 0 : i32
    return %c0_i32, %c0_i32_0 : i32, i32
  }
  func.func @transform_4(%arg0: i32) -> (i32, i32) {
    %c0_i32 = arith.constant 0 : i32
    %c0_i32_0 = arith.constant 0 : i32
    %c0_i32_1 = arith.constant 0 : i32
    return %c0_i32, %c0_i32_0 : i32, i32
  }
  func.func @transform_5(%arg0: i32) -> (i32, i32) {
    %c0_i32 = arith.constant 0 : i32
    %c0_i32_0 = arith.constant 0 : i32
    %c0_i32_1 = arith.constant 0 : i32
    return %c0_i32, %c0_i32_0 : i32, i32
  }
  func.func @transform_6(%arg0: i32) -> (i32, i32) {
    %c0_i32 = arith.constant 0 : i32
    %c0_i32_0 = arith.constant 0 : i32
    %c0_i32_1 = arith.constant 0 : i32
    return %c0_i32, %c0_i32_0 : i32, i32
  }
  func.func @transform_7(%arg0: i32) -> (i32, i32) {
    %c0_i32 = arith.constant 0 : i32
    %c0_i32_0 = arith.constant 0 : i32
    return %arg0, %c0_i32 : i32, i32
  }
}

</mosaic_0001>

<bundles_post_ra>
// kernel: tpu_custom_call.1
= control target key start
LH: loop header
LB: loop body
LE: loop exit
PB: predicated region body
PF: predicated region fallthrough
CT: control target
= control target key end

     0   :  { %12 = vsyncpa [#allocation3], 0  ;;  %s825_s0 = inlined_call_operand.hbm [shape: f32[8,16], index: 0, kind: input, shape index: {}]   ;;  %s826_s1 = inlined_call_operand.hbm [shape: f32[16,128], index: 1, kind: input, shape index: {}]   ;;  %s827_s2 = inlined_call_operand.vmem [shape: f32[1,128], index: 2, kind: input, shape index: {}]   ;;  %s828_s3 = inlined_call_operand.hbm [shape: f32[128,128], index: 3, kind: input, shape index: {}]   ;;  %s829_s4 = inlined_call_operand.vmem [shape: f32[1,128], index: 4, kind: input, shape index: {}]   ;;  %s830_s5 = inlined_call_operand.hbm [shape: f32[128,128], index: 5, kind: input, shape index: {}]   ;;  %s831_s6 = inlined_call_operand.vmem [shape: f32[1,128], index: 6, kind: input, shape index: {}]   ;;  %s832_s7 = inlined_call_operand.hbm [shape: f32[8,128], index: 7, kind: output, shape index: {}]  }
   0x1   :  { %13 = vsyncpa [#allocation6], 0 }
   0x2   :  { %14 = vsyncpa [#allocation9], 0 }
   0x3   :  { %15 = vsyncpa [#allocation4], 0  ;;  %s677_s24 = smov [#allocation5]   ;;  %s559_s28 = scalar_lea.hbm %s826_s1, 256 }
   0x4   :  { %s31_s25 = sshll.u32 %s677_s24, 4  ;;  %p560_p0 = scmp.ne.s32.totalorder %s826_s1, %s559_s28  ;;  %s32_s25 = int_to_ptr.vmem [resolvable:$true] %s31_s25 }
   0x5   :  { %p563_p1 = scmp.lt.u32.totalorder %s559_s28, %s826_s1 }
   0x7   :  { %p565_p2 = pnand %p563_p1, %p560_p0 }
   0x9   :  { %568 = shalt.err (!%p565_p2)
}
   0xa   :  { %s569_s10 = scalar_lea.vmem %s32_s25, 256  ;;  %p574_p4 = scmp.lt.s32.totalorder %s32_s25, %s32_s25 }
   0xb   :  { %p570_p3 = scmp.ne.s32.totalorder %s32_s25, %s569_s10  ;;  %p575_p5 = scmp.lt.s32.totalorder %s569_s10, %s569_s10 }
   0xd   :  { %p576_p6 = por %p575_p5, %p574_p4 }
   0xf   :  { %p577_p7 = pnand %p576_p6, %p570_p3 }
  0x11   :  { %580 = shalt.err (!%p577_p7)
}
  0x12   :  { %s678_s11 = smov 128   ;;  %s679_s12 = smov 8  }
  0x13   :  { %37 = dma.hbm_to_vmem [thread:$0]  %s826_s1, 256, %s32_s25, [#allocation6], %s678_s11, %s678_s11, %s679_s12  }
  0x14   :  { %s680_s15 = smov [#allocation2]   ;;  %s681_s17 = smov [#allocation7]  }
  0x15   :  { %s22_s16 = sshll.u32 %s680_s15, 4  ;;  %s45_s18 = sshll.u32 %s681_s17, 4  ;;  %s23_s16 = int_to_ptr.vmem [resolvable:$true] %s22_s16  ;;  %s46_s18 = int_to_ptr.vmem [resolvable:$true] %s45_s18 }
  0x16   :  { %s581_s21 = scalar_lea.hbm %s825_s0, 128 }
  0x17   :  { %p582_p8 = scmp.ne.s32.totalorder %s825_s0, %s581_s21  ;;  %p585_p9 = scmp.lt.u32.totalorder %s581_s21, %s825_s0 }
  0x19   :  { %p587_p10 = pnand %p585_p9, %p582_p8 }
  0x1b   :  { %590 = shalt.err (!%p587_p10)
}
  0x1c   :  { %s591_s1 = scalar_lea.vmem %s23_s16, 128  ;;  %p596_p12 = scmp.lt.s32.totalorder %s23_s16, %s23_s16 }
  0x1d   :  { %p592_p11 = scmp.ne.s32.totalorder %s23_s16, %s591_s1  ;;  %p597_p13 = scmp.lt.s32.totalorder %s591_s1, %s591_s1 }
  0x1f   :  { %p598_p0 = por %p597_p13, %p596_p12 }
  0x21   :  { %p599_p1 = pnand %p598_p0, %p592_p11 }
  0x23   :  { %602 = shalt.err (!%p599_p1)
}
  0x24   :  { %25 = dma.hbm_to_vmem [thread:$0]  %s825_s0, 128, %s23_s16, [#allocation3]  }
  0x25   :  { %s603_s30 = scalar_lea.hbm %s828_s3, 2048 }
  0x26   :  { %p604_p2 = scmp.ne.s32.totalorder %s828_s3, %s603_s30  ;;  %p607_p3 = scmp.lt.u32.totalorder %s603_s30, %s828_s3 }
  0x28   :  { %p609_p4 = pnand %p607_p3, %p604_p2 }
  0x2a   :  { %612 = shalt.err (!%p609_p4)
}
  0x2b   :  { %s613_s14 = scalar_lea.vmem %s46_s18, 2048  ;;  %p618_p6 = scmp.lt.s32.totalorder %s46_s18, %s46_s18 }
  0x2c   :  { %p614_p5 = scmp.ne.s32.totalorder %s46_s18, %s613_s14  ;;  %p619_p7 = scmp.lt.s32.totalorder %s613_s14, %s613_s14 }
  0x2e   :  { %p620_p8 = por %p619_p7, %p618_p6 }
  0x30   :  { %p621_p9 = pnand %p620_p8, %p614_p5 }
  0x32   :  { %624 = shalt.err (!%p621_p9)
}
  0x33   :  { %51 = dma.hbm_to_vmem [thread:$0]  %s828_s3, 2048, %s46_s18, [#allocation6], %s678_s11, %s678_s11, %s679_s12  }
  0x34   :  { %s682_s16 = smov [#allocation8]   ;;  %s625_s21 = scalar_lea.hbm %s830_s5, 2048 }
  0x35   :  { %s59_s17 = sshll.u32 %s682_s16, 4  ;;  %p626_p10 = scmp.ne.s32.totalorder %s830_s5, %s625_s21  ;;  %s60_s17 = int_to_ptr.vmem [resolvable:$true] %s59_s17 }
  0x36   :  { %p629_p11 = scmp.lt.u32.totalorder %s625_s21, %s830_s5 }
  0x38   :  { %p631_p12 = pnand %p629_p11, %p626_p10 }
  0x3a   :  { %634 = shalt.err (!%p631_p12)
}
  0x3b   :  { %s635_s1 = scalar_lea.vmem %s60_s17, 2048  ;;  %p640_p0 = scmp.lt.s32.totalorder %s60_s17, %s60_s17 }
  0x3c   :  { %p636_p13 = scmp.ne.s32.totalorder %s60_s17, %s635_s1  ;;  %p641_p1 = scmp.lt.s32.totalorder %s635_s1, %s635_s1 }
  0x3e   :  { %p642_p2 = por %p641_p1, %p640_p0 }
  0x40   :  { %p643_p3 = pnand %p642_p2, %p636_p13 }
  0x42   :  { %646 = shalt.err (!%p643_p3)
}
  0x43   :  { %65 = dma.hbm_to_vmem [thread:$0]  %s830_s5, 2048, %s60_s17, [#allocation9], %s678_s11, %s678_s11, %s679_s12  }
  0x44   :  { %669 = dma.done.wait [#allocation3], 128  }
  0x45   :  { %670 = vsyncadd [#allocation3], 4294967168 }
  0x46   :  { %671 = dma.done.wait [#allocation6], 2304  }
  0x47   :  { %672 = vsyncadd [#allocation6], 4294964992 }
  0x48   :  { %673 = dma.done.wait [#allocation9], 2048  }
  0x49   :  { %674 = vsyncadd [#allocation9], 4294965248  ;;  %v683_v0 = vmov 0.0|0.0   ;;  %vm684_vm0 = vmmov 0   ;;  %v685_v1 = vmov 0.0   ;;  %v81_v2 = vld [vmem:[#allocation5] sm:$0xff] }
  0x4a   :  { %494 = vmatprep.subr.bf16.mxu0 %v683_v0  ;;  %421 = vmatprep.mubr.msk.f32.mxu0 %vm684_vm0, %v685_v1  ;;  %v82_v3 = vld [vmem:[#allocation5 + $0x8] sm:$0xff]  ;;  %v164_v5 = vld [vmem:[#allocation7] sm:$0xff]  ;;  %v165_v6 = vld [vmem:[#allocation7 + $0x8] sm:$0xff]  ;;  %vm90_vm1 = vcmask 130048  }
  0x4b   :  { %497 = vmatprep.subr.bf16.mxu1 %v683_v0  ;;  %456 = vmatprep.mubr.msk.f32.mxu1 %vm684_vm0, %v685_v1  ;;  %v495_v4 = vpack.c.bf16 %v82_v3, %v81_v2  ;;  %v166_v7 = vld [vmem:[#allocation7 + $0x10] sm:$0xff]  ;;  %v498_v8 = vpack.c.bf16 %v165_v6, %v164_v5  ;;  %v167_v9 = vld [vmem:[#allocation7 + $0x18] sm:$0xff]  ;;  %v80_v10 = vld [vmem:[#allocation2] sm:$0xff] }
  0x4c   :  { %v501_v11 = vpack.c.bf16 %v167_v9, %v166_v7  ;;  %v168_v12 = vld [vmem:[#allocation7 + $0x20] sm:$0xff]  ;;  %v169_v13 = vld [vmem:[#allocation7 + $0x28] sm:$0xff]  ;;  %v170_v15 = vld [vmem:[#allocation7 + $0x30] sm:$0xff] }
  0x4d   :  { %496 = vmatpush3.bf16.msra.mxu0 %v495_v4  ;;  %499 = vmatpush3.bf16.msra.mxu1 %v498_v8  ;;  %v504_v14 = vpack.c.bf16 %v169_v13, %v168_v12  ;;  %v171_v16 = vld [vmem:[#allocation7 + $0x38] sm:$0xff]  ;;  %v172_v18 = vld [vmem:[#allocation7 + $0x40] sm:$0xff]  ;;  %v173_v19 = vld [vmem:[#allocation7 + $0x48] sm:$0xff] }
  0x4e   :  { %521 = vmatprep.subr.bf16.mxu0 %v683_v0  ;;  %500 = vmatprep.subr.bf16.mxu1 %v683_v0  ;;  %v507_v17 = vpack.c.bf16 %v171_v16, %v170_v15  ;;  %v510_v20 = vpack.c.bf16 %v173_v19, %v172_v18  ;;  %v174_v21 = vld [vmem:[#allocation7 + $0x50] sm:$0xff]  ;;  %v175_v22 = vld [vmem:[#allocation7 + $0x58] sm:$0xff]  ;;  %v176_v24 = vld [vmem:[#allocation7 + $0x60] sm:$0xff] }
  0x4f   :  { %v513_v23 = vpack.c.bf16 %v175_v22, %v174_v21  ;;  %v177_v25 = vld [vmem:[#allocation7 + $0x68] sm:$0xff]  ;;  %v178_v27 = vld [vmem:[#allocation7 + $0x70] sm:$0xff]  ;;  %v179_v28 = vld [vmem:[#allocation7 + $0x78] sm:$0xff] }
  0x50   :  { %422 = vmatmul.mubr.msk.f32.vlgmr.msra.gmra.mrb[0].mxu0 %vm90_vm1, %v80_v10  ;;  %v516_v26 = vpack.c.bf16 %v177_v25, %v176_v24  ;;  %v519_v29 = vpack.c.bf16 %v179_v28, %v178_v27  ;;  %v258_v30 = vld [vmem:[#allocation8] sm:$0xff]  ;;  %v259_v31 = vld [vmem:[#allocation8 + $0x8] sm:$0xff]  ;;  %v260_v32 = vld [vmem:[#allocation8 + $0x10] sm:$0xff] }
  0x51   :  { %491 = vmatprep.mubr.msk.f32.mxu0 %vm684_vm0, %v685_v1  ;;  %502 = vmatpush3.bf16.msra.mxu1 %v501_v11  ;;  %v522_v33 = vpack.c.bf16 %v259_v31, %v258_v30  ;;  %v261_v34 = vld [vmem:[#allocation8 + $0x18] sm:$0xff]  ;;  %v262_v36 = vld [vmem:[#allocation8 + $0x20] sm:$0xff]  ;;  %v263_v37 = vld [vmem:[#allocation8 + $0x28] sm:$0xff] }
  0x52   :  { %503 = vmatprep.subr.bf16.mxu1 %v683_v0  ;;  %v525_v35 = vpack.c.bf16 %v261_v34, %v260_v32  ;;  %v528_v38 = vpack.c.bf16 %v263_v37, %v262_v36  ;;  %v264_v39 = vld [vmem:[#allocation8 + $0x30] sm:$0xff]  ;;  %v265_v40 = vld [vmem:[#allocation8 + $0x38] sm:$0xff]  ;;  %v266_v42 = vld [vmem:[#allocation8 + $0x40] sm:$0xff] }
  0x53   :  { %523 = vmatpush3.bf16.msra.mxu0 %v522_v33  ;;  %v531_v41 = vpack.c.bf16 %v265_v40, %v264_v39  ;;  %v267_v43 = vld [vmem:[#allocation8 + $0x48] sm:$0xff]  ;;  %v268_v45 = vld [vmem:[#allocation8 + $0x50] sm:$0xff]  ;;  %v269_v46 = vld [vmem:[#allocation8 + $0x58] sm:$0xff] }
  0x54   :  { %524 = vmatprep.subr.bf16.mxu0 %v683_v0  ;;  %v534_v44 = vpack.c.bf16 %v267_v43, %v266_v42  ;;  %v537_v47 = vpack.c.bf16 %v269_v46, %v268_v45  ;;  %v270_v48 = vld [vmem:[#allocation8 + $0x60] sm:$0xff]  ;;  %v271_v49 = vld [vmem:[#allocation8 + $0x68] sm:$0xff]  ;;  %v272_v55 = vld [vmem:[#allocation8 + $0x70] sm:$0xff] }
  0x55   :  { %505 = vmatpush3.bf16.msra.mxu1 %v504_v14  ;;  %v540_v50 = vpack.c.bf16 %v271_v49, %v270_v48  ;;  %v375_v51 = vld [vmem:[%s827_s2] ss:$0 sm:$0xff]  ;;  %v273_v56 = vld [vmem:[#allocation8 + $0x78] sm:$0xff]  ;;  %s686_s2 = smov [#allocation10]  }
  0x56   :  { %506 = vmatprep.subr.bf16.mxu1 %v683_v0  ;;  %v543_v57 = vpack.c.bf16 %v273_v56, %v272_v55  ;;  %v377_v58 = vld [vmem:[%s829_s4] ss:$0 sm:$0xff]  ;;  %s364_s29 = sshll.u32 %s686_s2, 4  ;;  %s365_s29 = int_to_ptr.vmem [resolvable:$true] %s364_s29 }
  0x57   :  { %526 = vmatpush3.bf16.msra.mxu0 %v525_v35  ;;  %v378_v63 = vld [vmem:[%s831_s6] ss:$0 sm:$0xff]  ;;  %s647_s4 = scalar_lea.vmem %s365_s29, 128  ;;  %p652_p5 = scmp.lt.s32.totalorder %s365_s29, %s365_s29 }
  0x58   :  { %527 = vmatprep.subr.bf16.mxu0 %v683_v0  ;;  %p648_p4 = scmp.ne.s32.totalorder %s365_s29, %s647_s4  ;;  %p653_p6 = scmp.lt.s32.totalorder %s647_s4, %s647_s4 }
  0x59   :  { %508 = vmatpush3.bf16.msra.mxu1 %v507_v17 }
  0x5a   :  { %509 = vmatprep.subr.bf16.mxu1 %v683_v0  ;;  %p654_p7 = por %p653_p6, %p652_p5 }
  0x5b   :  { %529 = vmatpush3.bf16.msra.mxu0 %v528_v38 }
  0x5c   :  { %530 = vmatprep.subr.bf16.mxu0 %v683_v0  ;;  %p655_p8 = pnand %p654_p7, %p648_p4 }
  0x5d   :  { %511 = vmatpush3.bf16.msra.mxu1 %v510_v20 }
  0x5e   :  { %512 = vmatprep.subr.bf16.mxu1 %v683_v0 }
  0x5f   :  { %532 = vmatpush3.bf16.msra.mxu0 %v531_v41 }
  0x60   :  { %533 = vmatprep.subr.bf16.mxu0 %v683_v0 }
  0x61   :  { %514 = vmatpush3.bf16.msra.mxu1 %v513_v23 }
  0x62   :  { %515 = vmatprep.subr.bf16.mxu1 %v683_v0 }
  0x63   :  { %535 = vmatpush3.bf16.msra.mxu0 %v534_v44 }
  0x64   :  { %536 = vmatprep.subr.bf16.mxu0 %v683_v0 }
  0x65   :  { %517 = vmatpush3.bf16.msra.mxu1 %v516_v26 }
  0x66   :  { %518 = vmatprep.subr.bf16.mxu1 %v683_v0 }
  0x67   :  { %538 = vmatpush3.bf16.msra.mxu0 %v537_v47 }
  0x68   :  { %539 = vmatprep.subr.bf16.mxu0 %v683_v0 }
  0x69   :  { %520 = vmatpush3.bf16.msra.mxu1 %v519_v29 }
  0x6b   :  { %541 = vmatpush3.bf16.msra.mxu0 %v540_v50 }
  0x6c   :  { %542 = vmatprep.subr.bf16.mxu0 %v683_v0 }
  0x6f   :  { %544 = vmatpush3.bf16.msra.mxu0 %v543_v57 }
 0x123   :  { %v160_v52 = vpop.f32.mrb[0].mxu0 }
 0x124   :  { %v161_v53 = vadd.f32 %v375_v51, %v160_v52  ;;  %v423_v54 = vpop.f32.mrb[1].mxu0 }
 0x126   :  { %457 = vmatmul.mubr.f32.vlgmr.msra.gmra.mrb[0].mxu1 %v161_v53 }
 0x1f9   :  { %v253_v59 = vpop.f32.mrb[0].mxu1 }
 0x1fa   :  { %v254_v60 = vadd.f32 %v377_v58, %v253_v59  ;;  %v458_v61 = vpop.f32.mrb[1].mxu1 }
 0x1fc   :  { %v257_v62 = vmax.f32 %v254_v60, 0.0 }
 0x1fe   :  { %492 = vmatmul.mubr.f32.vlgmr.msra.gmra.mrb[2].mxu0 %v257_v62 }
 0x2d1   :  { %v347_v0 = vpop.f32.mrb[2].mxu0 }
 0x2d2   :  { %v348_v1 = vadd.f32 %v378_v63, %v347_v0  ;;  %v493_v2 = vpop.f32.mrb[3].mxu0 }
 0x2d4   :  { %v379_v3 = vmul.f32 -1.442695, %v348_v1 }
 0x2d6   :  { %555 = vpow2.f32 %v379_v3 }
 0x2e0   :  { %v556_v4 = vpop.eup %555 }
 0x2e1   :  { %v354_v5 = vadd.f32 1.0, %v556_v4 }
 0x2e3   :  { %557 = vrcp.f32 %v354_v5 }
 0x2ed   :  { %v558_v6 = vpop.eup %557 }
 0x2ee   :  { %357 = vst [vmem:[#allocation10] sm:$0xff] %v558_v6 }
 0x2ef   :  { %658 = shalt.err (!%p655_p8)
}
 0x2f0   :  { %s659_s8 = scalar_lea.hbm %s832_s7, 128 }
 0x2f1   :  { %p660_p9 = scmp.ne.s32.totalorder %s832_s7, %s659_s8  ;;  %p663_p10 = scmp.lt.u32.totalorder %s659_s8, %s832_s7 }
 0x2f3   :  { %p665_p11 = pnand %p663_p10, %p660_p9 }
 0x2f5   :  { %668 = shalt.err (!%p665_p11)
}
 0x2f6   :  { %367 = dma.vmem_to_hbm [thread:$0]  %s365_s29, 128, %s832_s7, [#allocation4]  }
 0x2f7   :  { %675 = dma.done.wait [#allocation4], 128  }
 0x2f8   :  { %676 = vsyncadd [#allocation4], 4294967168 }
 0x2f9   :  { %371 = vsyncpa [#allocation3], 1 }
 0x2fa   :  { %372 = vsyncpa [#allocation6], 1 }
 0x2fb   :  { %373 = vsyncpa [#allocation9], 1 }
 0x2fc   :  { %374 = vsyncpa [#allocation4], 1 }

</bundles_post_ra>
